<compile_context>
chip_gen: v7x
topology: tpu7x:2x2x1
jax: 0.10.0
libtpu: 0.0.40
codegen_flags: <defaults>
</compile_context>

<pallas_src>
import functools
import math

import jax
import jax.numpy as jnp
from jax.experimental import pallas as pl
from jax.experimental.pallas import tpu as pltpu


LANE = 128  # TPU lane width; head output is padded to this so stores are lane-dense.


# ----------------------------- shared in-kernel helpers ---------------------------

def _gelu_exact(x):
    # nn.GELU() default = exact erf formulation
    return 0.5 * x * (1.0 + jax.lax.erf(x / jnp.sqrt(jnp.float32(2.0))))


def _layernorm2d(x, gamma, beta):
    # LayerNorm2d: normalize over the channel axis (last axis in rows x C layout), eps=1e-6
    mu = jnp.mean(x, axis=-1, keepdims=True)
    var = jnp.mean((x - mu) ** 2, axis=-1, keepdims=True)
    return (x - mu) * jax.lax.rsqrt(var + 1e-6) * gamma + beta


# ----------------------------- mask_downscaling kernels (dead path, off by default) ----

def mask_stage1_kernel(p_ref, w_ref, b_ref, gw_ref, gb_ref, o_ref):
    # Conv2d(1, C1, k=2, s=2) as a patch matmul, then LayerNorm2d, then GELU.
    x = jnp.dot(p_ref[0], w_ref[...], preferred_element_type=jnp.float32) + b_ref[...]
    x = _layernorm2d(x, gw_ref[...], gb_ref[...])
    x = _gelu_exact(x)
    o_ref[...] = x[None]


def mask_stage2_kernel(p_ref, w2_ref, b2_ref, gw2_ref, gb2_ref, w3_ref, b3_ref, o_ref):
    # Conv2d(C1, C2, k=2, s=2) -> LayerNorm2d -> GELU -> Conv2d(C2, C, k=1)
    x = jnp.dot(p_ref[0], w2_ref[...], preferred_element_type=jnp.float32) + b2_ref[...]
    x = _layernorm2d(x, gw2_ref[...], gb2_ref[...])
    x = _gelu_exact(x)
    x = jnp.dot(x, w3_ref[...], preferred_element_type=jnp.float32) + b3_ref[...]
    o_ref[...] = x[None]


# ----------------------------- fused transformer + head kernel --------------------

def transformer_head_kernel(tok_ref, img_ref, pek_ref,
                            wq_ref, bq_ref, wkv_ref, bv_ref, wo_ref, bo_ref,
                            hw1_ref, hb1_ref, hw2_ref, hb2_ref, hw3_ref, hb3_ref,
                            out_ref, *, exact_softmax=False):
    tok = tok_ref[...]                       # (Bb, NT, C) f32  [disc_token ; cond_emb]
    img = img_ref[...]                       # (Bb, HW, C) bf16 (pre-cast in wrapper)
    Bb, NT, C = tok.shape
    HW = img.shape[1]
    scale = 1.0 / math.sqrt(C)

    # ---- projections as flat 2-D matmuls: batch merged into sublane rows ----------
    tok2 = tok.reshape(Bb * NT, C)
    img2 = img.reshape(Bb * HW, C)

    q2 = jnp.dot(tok2.astype(jnp.bfloat16), wq_ref[...],
                 preferred_element_type=jnp.float32) + bq_ref[...]        # (Bb*NT, C)
    kv2 = jnp.dot(img2, wkv_ref[...],
                  preferred_element_type=jnp.float32)                     # (Bb*HW, 2C)

    q = q2.reshape(Bb, NT, C)
    kv = kv2.reshape(Bb, HW, 2 * C)
    k = kv[:, :, :C] + pek_ref[...]          # pek = pe @ wk + bk (precomputed constant)
    v = kv[:, :, C:] + bv_ref[...]

    # ---- single-head cross attention (only these two einsums need the batch dim) --
    s = jnp.einsum('bqc,bkc->bqk', q.astype(jnp.bfloat16), k.astype(jnp.bfloat16),
                   preferred_element_type=jnp.float32) * scale            # (Bb, NT, HW)
    s = s - jnp.max(s, axis=-1, keepdims=True)
    p = jnp.exp(s)
    denom = jnp.sum(p, axis=-1, keepdims=True)
    if exact_softmax:
        p = p / denom
    else:
        p = p * pl.reciprocal(denom, approx=True)                         # EUP slot
    a = jnp.einsum('bqk,bkc->bqc', p.astype(jnp.bfloat16), v.astype(jnp.bfloat16),
                   preferred_element_type=jnp.float32)                    # (Bb, NT, C)

    o2 = jnp.dot(a.reshape(Bb * NT, C).astype(jnp.bfloat16), wo_ref[...],
                 preferred_element_type=jnp.float32) + bo_ref[...]        # (Bb*NT, C)

    # ---- residual + 3-layer MLP head on the discriminator token only --------------
    hs0 = tok[:, 0, :] + o2.reshape(Bb, NT, C)[:, 0, :]                   # (Bb, C) f32
    x = jnp.dot(hs0.astype(jnp.bfloat16), hw1_ref[...],
                preferred_element_type=jnp.float32) + hb1_ref[...]
    x = jnp.maximum(x, 0.0)
    x = jnp.dot(x.astype(jnp.bfloat16), hw2_ref[...],
                preferred_element_type=jnp.float32) + hb2_ref[...]
    x = jnp.maximum(x, 0.0)
    x = jnp.dot(x.astype(jnp.bfloat16), hw3_ref[...],
                preferred_element_type=jnp.float32) + hb3_ref[...]        # (Bb, LANE)

    # lane-dense store: (Bb, 1, 128) slab; only column 0 carries the real logit
    out_ref[...] = x.reshape(Bb, 1, LANE)


# ----------------------------- JAX glue -------------------------------------------

def _patches_2x2(x):
    """NCHW -> (B, (H/2)*(W/2), Cin*2*2) patches for a k=2, s=2 conv (order: cin, kh, kw)."""
    B, Cin, H, W = x.shape
    x = x.reshape(B, Cin, H // 2, 2, W // 2, 2)
    x = x.transpose(0, 2, 4, 1, 3, 5)            # (B, H/2, W/2, Cin, 2, 2)
    return x.reshape(B, (H // 2) * (W // 2), Cin * 4)


def position_embedding_random(gauss, size):
    """PositionEmbeddingRandom for a (H, W) grid -> (H*W, C), C = 2 * num_pos_feats."""
    h, w = size
    ones = jnp.ones((h, w), dtype=jnp.float32)
    y_embed = (jnp.cumsum(ones, axis=0) - 0.5) / h
    x_embed = (jnp.cumsum(ones, axis=1) - 0.5) / w
    coords = jnp.stack([x_embed, y_embed], axis=-1)      # (h, w, 2)
    coords = 2.0 * coords - 1.0
    coords = coords @ gauss                               # (h, w, C/2)
    coords = 2.0 * jnp.pi * coords
    pe = jnp.concatenate([jnp.sin(coords), jnp.cos(coords)], axis=-1)   # (h, w, C)
    return pe.reshape(h * w, pe.shape[-1])                # row-major flatten == torch path


def mask_downscaling(mask, p):
    """mask: (B, 1, Hm, Wm) NCHW -> (B, C, Hm/4, Wm/4) NCHW.

    Result is dead in the reference forward; only invoked when intermediate parity is
    explicitly requested (compute_mask_downscaling=True)."""
    B, Cin, Hm, Wm = mask.shape
    H1, W1 = Hm // 2, Wm // 2
    H2, W2 = H1 // 2, W1 // 2
    C1 = p["conv1_w"].shape[1]
    C2 = p["conv2_w"].shape[1]
    C = p["conv3_w"].shape[1]

    patches1 = _patches_2x2(mask)                         # (B, H1*W1, Cin*4)
    HW1, K1 = patches1.shape[1], patches1.shape[2]
    x1 = pl.pallas_call(
        mask_stage1_kernel,
        out_shape=jax.ShapeDtypeStruct((B, HW1, C1), jnp.float32),
        grid_spec=pltpu.PrefetchScalarGridSpec(
            num_scalar_prefetch=0,
            grid=(B,),
            in_specs=[
                pl.BlockSpec((1, HW1, K1), lambda b: (b, 0, 0)),
                pl.BlockSpec((K1, C1), lambda b: (0, 0)),
                pl.BlockSpec((1, C1), lambda b: (0, 0)),
                pl.BlockSpec((1, C1), lambda b: (0, 0)),
                pl.BlockSpec((1, C1), lambda b: (0, 0)),
            ],
            out_specs=pl.BlockSpec((1, HW1, C1), lambda b: (b, 0, 0)),
        ),
        compiler_params=pltpu.CompilerParams(dimension_semantics=("parallel",)),
    )(patches1, p["conv1_w"], p["conv1_b"], p["ln1_w"], p["ln1_b"])

    x1_nchw = x1.reshape(B, H1, W1, C1).transpose(0, 3, 1, 2)
    patches2 = _patches_2x2(x1_nchw)                      # (B, H2*W2, C1*4)
    HW2, K2 = patches2.shape[1], patches2.shape[2]
    x3 = pl.pallas_call(
        mask_stage2_kernel,
        out_shape=jax.ShapeDtypeStruct((B, HW2, C), jnp.float32),
        grid_spec=pltpu.PrefetchScalarGridSpec(
            num_scalar_prefetch=0,
            grid=(B,),
            in_specs=[
                pl.BlockSpec((1, HW2, K2), lambda b: (b, 0, 0)),
                pl.BlockSpec((K2, C2), lambda b: (0, 0)),
                pl.BlockSpec((1, C2), lambda b: (0, 0)),
                pl.BlockSpec((1, C2), lambda b: (0, 0)),
                pl.BlockSpec((1, C2), lambda b: (0, 0)),
                pl.BlockSpec((C2, C), lambda b: (0, 0)),
                pl.BlockSpec((1, C), lambda b: (0, 0)),
            ],
            out_specs=pl.BlockSpec((1, HW2, C), lambda b: (b, 0, 0)),
        ),
        compiler_params=pltpu.CompilerParams(dimension_semantics=("parallel",)),
    )(patches2, p["conv2_w"], p["conv2_b"], p["ln2_w"], p["ln2_b"], p["conv3_w"], p["conv3_b"])

    return x3.reshape(B, H2, W2, C).transpose(0, 3, 1, 2)


def prepare_discriminator_params(p, image_size):
    """One-time (per model / image size) precomputation, hoisted off the per-call path."""
    H, W = image_size
    C = p["wq"].shape[0]
    # positional encoding (reference requests fp16, then it participates in fp32 compute)
    pe = position_embedding_random(p["pe_gauss"], (H, W))
    pe = pe.astype(jnp.float16).astype(jnp.float32)                     # (HW, C)
    # k = (img + pe) @ wk + bk  ==  img @ wk + (pe @ wk + bk); the bracket is constant
    pek_bias = pe @ p["wk"] + p["bk"]                                   # (HW, C) f32
    wkv = jnp.concatenate([p["wk"], p["wv"]], axis=1)                   # (C, 2C) fused K|V
    # lane-dense head output: pad W3 (C,1)->(C,LANE), b3 (1,1)->(1,LANE); only col 0 real
    hw3_pad = jnp.zeros((C, LANE), jnp.float32).at[:, 0:1].set(p["hw3"])
    hb3_pad = jnp.zeros((1, LANE), jnp.float32).at[:, 0:1].set(p["hb3"])

    bf = lambda w: w.astype(jnp.bfloat16)   # matmul weights bf16, biases stay f32
    return dict(
        disc_token=p["disc_token"],
        pek_bias=pek_bias,
        wq=bf(p["wq"]), bq=p["bq"],
        wkv=bf(wkv), bv=p["bv"],
        wo=bf(p["wo"]), bo=p["bo"],
        hw1=bf(p["hw1"]), hb1=p["hb1"],
        hw2=bf(p["hw2"]), hb2=p["hb2"],
        hw3=bf(hw3_pad), hb3=hb3_pad,
    )


def _head_cost_estimate(B, NT, HW, C, operands, out_bytes):
    flops = 2 * B * (NT * C * C              # q projection
                     + HW * C * 2 * C        # fused k|v projection
                     + 2 * NT * HW * C       # attention scores + p@v
                     + NT * C * C            # output projection
                     + 2 * C * C + C * LANE) # 3-layer head on the disc token only
    transcendentals = B * NT * (HW + 1)      # softmax exp + reciprocal
    bytes_accessed = int(out_bytes) + sum(int(a.size) * a.dtype.itemsize for a in operands)
    return pl.CostEstimate(flops=int(flops), transcendentals=int(transcendentals),
                           bytes_accessed=int(bytes_accessed))


def discriminator_forward(image_embeddings, condition_embeddings, mask, prepared,
                          *, raw_params=None, compute_mask_downscaling=False,
                          batch_block=None, core_parallel=False, exact_softmax=False):
    """image_embeddings: (B, C, H, W), condition_embeddings: (B, Nc, C), mask: (B, 1, 4H, 4W).

    batch_block=None : single no-grid pallas_call, whole batch in one VMEM block
                       (best at small/medium sizes on all generations — no per-step overhead).
    batch_block=Bb   : grid over batch blocks of Bb elements; use once B*HW*C no longer
                       fits a single VMEM block (v7x: 64 MiB physical / 32 MiB scoped).
                       core_parallel=True switches the axis to CORE_PARALLEL (v7x only).
    """
    B, C, H, W = image_embeddings.shape
    HW = H * W

    if compute_mask_downscaling:
        # Reference computes this, but its result is dead in the forward pass; default off.
        assert raw_params is not None
        _ = mask_downscaling(mask, raw_params)

    # tokens = cat(discriminator_token, condition_embeddings); kept f32 for the residual
    out_tok = jnp.broadcast_to(prepared["disc_token"][None], (B, 1, C))
    tokens = jnp.concatenate([out_tok, condition_embeddings], axis=1).astype(jnp.float32)
    NT = tokens.shape[1]

    # largest operand pre-cast to bf16 in the wrapper -> half the HBM->VMEM DMA bytes
    img_bf = image_embeddings.reshape(B, C, HW).transpose(0, 2, 1).astype(jnp.bfloat16)

    weights = (prepared["wq"], prepared["bq"], prepared["wkv"], prepared["bv"],
               prepared["wo"], prepared["bo"],
               prepared["hw1"], prepared["hb1"], prepared["hw2"], prepared["hb2"],
               prepared["hw3"], prepared["hb3"])
    operands = (tokens, img_bf, prepared["pek_bias"]) + weights

    out_shape = jax.ShapeDtypeStruct((B, 1, LANE), jnp.float32)
    cost = _head_cost_estimate(B, NT, HW, C, operands, out_bytes=B * LANE * 4)
    kernel = functools.partial(transformer_head_kernel, exact_softmax=exact_softmax)

    if batch_block is None:
        # default: single invocation, full-array VMEM-resident blocks
        out = pl.pallas_call(
            kernel,
            out_shape=out_shape,
            in_specs=[pl.BlockSpec(memory_space=pltpu.MemorySpace.VMEM)
                      for _ in operands],
            out_specs=pl.BlockSpec(memory_space=pltpu.MemorySpace.VMEM),
            cost_estimate=cost,
        )(*operands)
    else:
        Bb = int(batch_block)
        assert B % Bb == 0, "batch_block must divide the batch size"
        sem = (pltpu.CORE_PARALLEL,) if core_parallel else ("parallel",)
        out = pl.pallas_call(
            kernel,
            out_shape=out_shape,
            grid_spec=pltpu.PrefetchScalarGridSpec(
                num_scalar_prefetch=0,
                grid=(B // Bb,),
                in_specs=[
                    pl.BlockSpec((Bb, NT, C), lambda b: (b, 0, 0)),
                    pl.BlockSpec((Bb, HW, C), lambda b: (b, 0, 0)),
                    pl.BlockSpec((HW, C), lambda b: (0, 0)),
                    *[pl.BlockSpec(w.shape, lambda b, n=w.ndim: (0,) * n) for w in weights],
                ],
                out_specs=pl.BlockSpec((Bb, 1, LANE), lambda b: (b, 0, 0)),
            ),
            compiler_params=pltpu.CompilerParams(dimension_semantics=sem),
            cost_estimate=cost,
        )(*operands)

    # discriminator_token_out: token 0, real output column 0 -> (B, 1)
    return out[:, 0, 0:1]


# ----------------------------- deterministic parameter init -----------------------

def init_params(key, C, mask_in_chans):
    C1 = mask_in_chans // 4
    C2 = mask_in_chans
    ks = jax.random.split(key, 12)

    def n(k, shape, scale=0.05):
        return (scale * jax.random.normal(k, shape, dtype=jnp.float32))

    return dict(
        pe_gauss=jax.random.normal(ks[0], (2, C // 2), dtype=jnp.float32),
        disc_token=n(ks[1], (1, C)),
        # conv weights stored directly in matmul layout (Cin*kh*kw, Cout)
        conv1_w=n(ks[2], (1 * 2 * 2, C1)), conv1_b=jnp.zeros((1, C1), jnp.float32),
        ln1_w=jnp.ones((1, C1), jnp.float32), ln1_b=jnp.zeros((1, C1), jnp.float32),
        conv2_w=n(ks[3], (C1 * 2 * 2, C2)), conv2_b=jnp.zeros((1, C2), jnp.float32),
        ln2_w=jnp.ones((1, C2), jnp.float32), ln2_b=jnp.zeros((1, C2), jnp.float32),
        conv3_w=n(ks[4], (C2, C)), conv3_b=jnp.zeros((1, C), jnp.float32),
        # minimal single-head cross-attention "transformer"
        wq=n(ks[5], (C, C)), bq=jnp.zeros((1, C), jnp.float32),
        wk=n(ks[6], (C, C)), bk=jnp.zeros((1, C), jnp.float32),
        wv=n(ks[7], (C, C)), bv=jnp.zeros((1, C), jnp.float32),
        wo=n(ks[8], (C, C)), bo=jnp.zeros((1, C), jnp.float32),
        # discriminator_head = MLP(C, C, 1, 3)
        hw1=n(ks[9], (C, C)), hb1=jnp.zeros((1, C), jnp.float32),
        hw2=n(ks[10], (C, C)), hb2=jnp.zeros((1, C), jnp.float32),
        hw3=n(ks[11], (C, 1)), hb3=jnp.zeros((1, 1), jnp.float32),
    )


if __name__ == "__main__":
    B, C, H, W = 2, 32, 8, 8           # transformer_dim=32, image_embedding_size=(8, 8)
    mask_in_chans = 16
    N_cond = 7                          # -> NT = 1 + 7 = 8 tokens

    key = jax.random.PRNGKey(0)
    kp, k1, k2, k3 = jax.random.split(key, 4)
    params = init_params(kp, C, mask_in_chans)
    prepared = prepare_discriminator_params(params, (H, W))   # hoisted, once per model

    image_embeddings = jax.random.normal(k1, (B, C, H, W), dtype=jnp.float32)
    condition_embeddings = jax.random.normal(k2, (B, N_cond, C), dtype=jnp.float32)
    mask = jax.random.normal(k3, (B, 1, 4 * H, 4 * W), dtype=jnp.float32)

    # default fast path: mask_downscaling skipped (dead in the reference forward),
    # single fused no-grid transformer+head kernel over the whole batch
    fwd = jax.jit(lambda img, cond, m: discriminator_forward(img, cond, m, prepared))
    out = jax.block_until_ready(fwd(image_embeddings, condition_embeddings, mask))
    assert out.shape == (B, 1) and out.dtype == jnp.float32

    # batch-tiled variant (the large-B / VMEM-bounded path) must agree with the fused path
    out_grid = discriminator_forward(image_embeddings, condition_embeddings, mask,
                                     prepared, batch_block=1)
    out_grid = jax.block_until_ready(out_grid)
    assert jnp.allclose(out, out_grid, atol=1e-5, rtol=1e-5)

    print("KERNEL_OK")
</pallas_src>

<mosaic_0001>
module attributes {stable_mosaic.version = 11 : i64} {
  func.func @transformer_head_kernel(%arg0: memref<2x8x32xf32, #tpu.memory_space<vmem>>, %arg1: memref<2x64x32xbf16, #tpu.memory_space<vmem>>, %arg2: memref<64x32xf32, #tpu.memory_space<vmem>>, %arg3: memref<32x32xbf16, #tpu.memory_space<vmem>>, %arg4: memref<1x32xf32, #tpu.memory_space<vmem>>, %arg5: memref<32x64xbf16, #tpu.memory_space<vmem>>, %arg6: memref<1x32xf32, #tpu.memory_space<vmem>>, %arg7: memref<32x32xbf16, #tpu.memory_space<vmem>>, %arg8: memref<1x32xf32, #tpu.memory_space<vmem>>, %arg9: memref<32x32xbf16, #tpu.memory_space<vmem>>, %arg10: memref<1x32xf32, #tpu.memory_space<vmem>>, %arg11: memref<32x32xbf16, #tpu.memory_space<vmem>>, %arg12: memref<1x32xf32, #tpu.memory_space<vmem>>, %arg13: memref<32x128xbf16, #tpu.memory_space<vmem>>, %arg14: memref<1x128xf32, #tpu.memory_space<vmem>>, %arg15: memref<2x1x128xf32, #tpu.memory_space<vmem>>) attributes {dimension_semantics = [], scalar_prefetch = 0 : i64, scratch_operands = 0 : i64, tpu.core_type = #tpu.core_type<tc>} {
    %c0 = arith.constant 0 : index
    %c0_0 = arith.constant 0 : index
    %c0_1 = arith.constant 0 : index
    %0 = vector.load %arg0[%c0, %c0_0, %c0_1] : memref<2x8x32xf32, #tpu.memory_space<vmem>>, vector<2x8x32xf32>
    %c0_2 = arith.constant 0 : index
    %c0_3 = arith.constant 0 : index
    %c0_4 = arith.constant 0 : index
    %1 = vector.load %arg1[%c0_2, %c0_3, %c0_4] : memref<2x64x32xbf16, #tpu.memory_space<vmem>>, vector<2x64x32xbf16>
    %2 = vector.shape_cast %0 : vector<2x8x32xf32> to vector<16x32xf32>
    %3 = vector.shape_cast %1 : vector<2x64x32xbf16> to vector<128x32xbf16>
    %4 = arith.truncf %2 : vector<16x32xf32> to vector<16x32xbf16>
    %c0_5 = arith.constant 0 : index
    %c0_6 = arith.constant 0 : index
    %5 = vector.load %arg3[%c0_5, %c0_6] : memref<32x32xbf16, #tpu.memory_space<vmem>>, vector<32x32xbf16>
    %cst = arith.constant dense<0.000000e+00> : vector<16x32xf32>
    %6 = tpu.matmul %4, %5, %cst {dimension_numbers = #tpu.dot_dimension_numbers<[1], [0], [0], [1], [0, 0, 1, 1], [], []>} : vector<16x32xbf16>, vector<32x32xbf16>, vector<16x32xf32> -> vector<16x32xf32>
    %c0_7 = arith.constant 0 : index
    %c0_8 = arith.constant 0 : index
    %7 = vector.load %arg4[%c0_7, %c0_8] : memref<1x32xf32, #tpu.memory_space<vmem>>, vector<1x32xf32>
    %8 = vector.broadcast %7 : vector<1x32xf32> to vector<16x32xf32>
    %9 = arith.addf %6, %8 : vector<16x32xf32>
    %c0_9 = arith.constant 0 : index
    %c0_10 = arith.constant 0 : index
    %10 = vector.load %arg5[%c0_9, %c0_10] : memref<32x64xbf16, #tpu.memory_space<vmem>>, vector<32x64xbf16>
    %cst_11 = arith.constant dense<0.000000e+00> : vector<128x64xf32>
    %11 = tpu.matmul %3, %10, %cst_11 {dimension_numbers = #tpu.dot_dimension_numbers<[1], [0], [0], [1], [0, 0, 1, 1], [], []>} : vector<128x32xbf16>, vector<32x64xbf16>, vector<128x64xf32> -> vector<128x64xf32>
    %12 = vector.shape_cast %9 : vector<16x32xf32> to vector<2x8x32xf32>
    %13 = vector.shape_cast %11 : vector<128x64xf32> to vector<2x64x64xf32>
    %14 = vector.extract_strided_slice %13 {offsets = [0, 0, 0], sizes = [2, 64, 32], strides = [1, 1, 1]} : vector<2x64x64xf32> to vector<2x64x32xf32>
    %c0_12 = arith.constant 0 : index
    %c0_13 = arith.constant 0 : index
    %15 = vector.load %arg2[%c0_12, %c0_13] : memref<64x32xf32, #tpu.memory_space<vmem>>, vector<64x32xf32>
    %16 = vector.shape_cast %15 : vector<64x32xf32> to vector<1x64x32xf32>
    %17 = vector.broadcast %16 : vector<1x64x32xf32> to vector<2x64x32xf32>
    %18 = arith.addf %14, %17 : vector<2x64x32xf32>
    %19 = vector.extract_strided_slice %13 {offsets = [0, 0, 32], sizes = [2, 64, 32], strides = [1, 1, 1]} : vector<2x64x64xf32> to vector<2x64x32xf32>
    %c0_14 = arith.constant 0 : index
    %c0_15 = arith.constant 0 : index
    %20 = vector.load %arg6[%c0_14, %c0_15] : memref<1x32xf32, #tpu.memory_space<vmem>>, vector<1x32xf32>
    %21 = vector.shape_cast %20 : vector<1x32xf32> to vector<1x1x32xf32>
    %22 = vector.broadcast %21 : vector<1x1x32xf32> to vector<2x64x32xf32>
    %23 = arith.addf %19, %22 : vector<2x64x32xf32>
    %24 = arith.truncf %12 : vector<2x8x32xf32> to vector<2x8x32xbf16>
    %25 = arith.truncf %18 : vector<2x64x32xf32> to vector<2x64x32xbf16>
    "tpu.trace_start"() <{level = 10 : i32, message = "bqc,bkc->bqk"}> : () -> ()
    %cst_16 = arith.constant dense<0.000000e+00> : vector<2x8x64xf32>
    %26 = tpu.matmul %24, %25, %cst_16 {dimension_numbers = #tpu.dot_dimension_numbers<[2], [2], [1], [1], [0, 0, 0, 1, 1, 1], [0], [0]>} : vector<2x8x32xbf16>, vector<2x64x32xbf16>, vector<2x8x64xf32> -> vector<2x8x64xf32>
    "tpu.trace_stop"() : () -> ()
    %cst_17 = arith.constant 0.176776692 : f32
    %27 = vector.broadcast %cst_17 : f32 to vector<2x8x64xf32>
    %28 = arith.mulf %26, %27 : vector<2x8x64xf32>
    %cst_18 = arith.constant dense<0xFF800000> : vector<2x8xf32>
    %29 = vector.multi_reduction <maximumf>, %28, %cst_18 [2] : vector<2x8x64xf32> to vector<2x8xf32>
    %30 = vector.shape_cast %29 : vector<2x8xf32> to vector<2x8x1xf32>
    %31 = vector.broadcast %30 : vector<2x8x1xf32> to vector<2x8x64xf32>
    %32 = arith.subf %28, %31 : vector<2x8x64xf32>
    %33 = math.exp %32 : vector<2x8x64xf32>
    %cst_19 = arith.constant dense<0.000000e+00> : vector<2x8xf32>
    %34 = vector.multi_reduction <add>, %33, %cst_19 [2] : vector<2x8x64xf32> to vector<2x8xf32>
    %35 = vector.shape_cast %34 : vector<2x8xf32> to vector<2x8x1xf32>
    %36 = tpu.reciprocal %35 {approx = true} : vector<2x8x1xf32> -> vector<2x8x1xf32>
    %37 = vector.broadcast %36 : vector<2x8x1xf32> to vector<2x8x64xf32>
    %38 = arith.mulf %33, %37 : vector<2x8x64xf32>
    %39 = arith.truncf %38 : vector<2x8x64xf32> to vector<2x8x64xbf16>
    %40 = arith.truncf %23 : vector<2x64x32xf32> to vector<2x64x32xbf16>
    "tpu.trace_start"() <{level = 10 : i32, message = "bqk,bkc->bqc"}> : () -> ()
    %cst_20 = arith.constant dense<0.000000e+00> : vector<2x8x32xf32>
    %41 = tpu.matmul %39, %40, %cst_20 {dimension_numbers = #tpu.dot_dimension_numbers<[2], [1], [1], [2], [0, 0, 0, 1, 1, 2], [0], [0]>} : vector<2x8x64xbf16>, vector<2x64x32xbf16>, vector<2x8x32xf32> -> vector<2x8x32xf32>
    "tpu.trace_stop"() : () -> ()
    %42 = vector.shape_cast %41 : vector<2x8x32xf32> to vector<16x32xf32>
    %43 = arith.truncf %42 : vector<16x32xf32> to vector<16x32xbf16>
    %c0_21 = arith.constant 0 : index
    %c0_22 = arith.constant 0 : index
    %44 = vector.load %arg7[%c0_21, %c0_22] : memref<32x32xbf16, #tpu.memory_space<vmem>>, vector<32x32xbf16>
    %cst_23 = arith.constant dense<0.000000e+00> : vector<16x32xf32>
    %45 = tpu.matmul %43, %44, %cst_23 {dimension_numbers = #tpu.dot_dimension_numbers<[1], [0], [0], [1], [0, 0, 1, 1], [], []>} : vector<16x32xbf16>, vector<32x32xbf16>, vector<16x32xf32> -> vector<16x32xf32>
    %c0_24 = arith.constant 0 : index
    %c0_25 = arith.constant 0 : index
    %46 = vector.load %arg8[%c0_24, %c0_25] : memref<1x32xf32, #tpu.memory_space<vmem>>, vector<1x32xf32>
    %47 = vector.broadcast %46 : vector<1x32xf32> to vector<16x32xf32>
    %48 = arith.addf %45, %47 : vector<16x32xf32>
    %49 = vector.extract_strided_slice %0 {offsets = [0, 0, 0], sizes = [2, 1, 32], strides = [1, 1, 1]} : vector<2x8x32xf32> to vector<2x1x32xf32>
    %50 = vector.shape_cast %49 : vector<2x1x32xf32> to vector<2x32xf32>
    %51 = vector.shape_cast %48 : vector<16x32xf32> to vector<2x8x32xf32>
    %52 = vector.extract_strided_slice %51 {offsets = [0, 0, 0], sizes = [2, 1, 32], strides = [1, 1, 1]} : vector<2x8x32xf32> to vector<2x1x32xf32>
    %53 = vector.shape_cast %52 : vector<2x1x32xf32> to vector<2x32xf32>
    %54 = arith.addf %50, %53 : vector<2x32xf32>
    %55 = arith.truncf %54 : vector<2x32xf32> to vector<2x32xbf16>
    %c0_26 = arith.constant 0 : index
    %c0_27 = arith.constant 0 : index
    %56 = vector.load %arg9[%c0_26, %c0_27] : memref<32x32xbf16, #tpu.memory_space<vmem>>, vector<32x32xbf16>
    %cst_28 = arith.constant dense<0.000000e+00> : vector<2x32xf32>
    %57 = tpu.matmul %55, %56, %cst_28 {dimension_numbers = #tpu.dot_dimension_numbers<[1], [0], [0], [1], [0, 0, 1, 1], [], []>} : vector<2x32xbf16>, vector<32x32xbf16>, vector<2x32xf32> -> vector<2x32xf32>
    %c0_29 = arith.constant 0 : index
    %c0_30 = arith.constant 0 : index
    %58 = vector.load %arg10[%c0_29, %c0_30] : memref<1x32xf32, #tpu.memory_space<vmem>>, vector<1x32xf32>
    %59 = vector.broadcast %58 : vector<1x32xf32> to vector<2x32xf32>
    %60 = arith.addf %57, %59 : vector<2x32xf32>
    %cst_31 = arith.constant 0.000000e+00 : f32
    %61 = vector.broadcast %cst_31 : f32 to vector<2x32xf32>
    %62 = arith.maximumf %60, %61 : vector<2x32xf32>
    %63 = arith.truncf %62 : vector<2x32xf32> to vector<2x32xbf16>
    %c0_32 = arith.constant 0 : index
    %c0_33 = arith.constant 0 : index
    %64 = vector.load %arg11[%c0_32, %c0_33] : memref<32x32xbf16, #tpu.memory_space<vmem>>, vector<32x32xbf16>
    %cst_34 = arith.constant dense<0.000000e+00> : vector<2x32xf32>
    %65 = tpu.matmul %63, %64, %cst_34 {dimension_numbers = #tpu.dot_dimension_numbers<[1], [0], [0], [1], [0, 0, 1, 1], [], []>} : vector<2x32xbf16>, vector<32x32xbf16>, vector<2x32xf32> -> vector<2x32xf32>
    %c0_35 = arith.constant 0 : index
    %c0_36 = arith.constant 0 : index
    %66 = vector.load %arg12[%c0_35, %c0_36] : memref<1x32xf32, #tpu.memory_space<vmem>>, vector<1x32xf32>
    %67 = vector.broadcast %66 : vector<1x32xf32> to vector<2x32xf32>
    %68 = arith.addf %65, %67 : vector<2x32xf32>
    %cst_37 = arith.constant 0.000000e+00 : f32
    %69 = vector.broadcast %cst_37 : f32 to vector<2x32xf32>
    %70 = arith.maximumf %68, %69 : vector<2x32xf32>
    %71 = arith.truncf %70 : vector<2x32xf32> to vector<2x32xbf16>
    %c0_38 = arith.constant 0 : index
    %c0_39 = arith.constant 0 : index
    %72 = vector.load %arg13[%c0_38, %c0_39] : memref<32x128xbf16, #tpu.memory_space<vmem>>, vector<32x128xbf16>
    %cst_40 = arith.constant dense<0.000000e+00> : vector<2x128xf32>
    %73 = tpu.matmul %71, %72, %cst_40 {dimension_numbers = #tpu.dot_dimension_numbers<[1], [0], [0], [1], [0, 0, 1, 1], [], []>} : vector<2x32xbf16>, vector<32x128xbf16>, vector<2x128xf32> -> vector<2x128xf32>
    %c0_41 = arith.constant 0 : index
    %c0_42 = arith.constant 0 : index
    %74 = vector.load %arg14[%c0_41, %c0_42] : memref<1x128xf32, #tpu.memory_space<vmem>>, vector<1x128xf32>
    %75 = vector.broadcast %74 : vector<1x128xf32> to vector<2x128xf32>
    %76 = arith.addf %73, %75 : vector<2x128xf32>
    %77 = vector.shape_cast %76 : vector<2x128xf32> to vector<2x1x128xf32>
    %c0_43 = arith.constant 0 : index
    %c0_44 = arith.constant 0 : index
    %c0_45 = arith.constant 0 : index
    %78 = vector.load %arg15[%c0_43, %c0_44, %c0_45] : memref<2x1x128xf32, #tpu.memory_space<vmem>>, vector<2x1x128xf32>
    tpu.vector_store %arg15[%c0_43, %c0_44, %c0_45], %77 {strides = array<i32>} : memref<2x1x128xf32, #tpu.memory_space<vmem>>, vector<2x1x128xf32>,
    return
  }
}

</mosaic_0001>

<bundles_post_ra>
// kernel: _lambda_.1
= control target key start
LH: loop header
LB: loop body
LE: loop exit
PB: predicated region body
PF: predicated region fallthrough
CT: control target
= control target key end

     0   :  { %v1181_v1 = vmov 0.0   ;;  %vm1182_vm0 = vmmov 0   ;;  %vm93_vm1 = vcmask 261120   ;;  %s1183_s22 = smov 32   ;;  %vm486_vm2 = vcmask 523264   ;;  %s1553_s5 = inlined_call_operand.vmem [shape: bf16[32,64], index: 5, kind: input, shape index: {}]   ;;  %s1554_s1 = inlined_call_operand.vmem [shape: bf16[2,64,32], index: 1, kind: input, shape index: {}]   ;;  %s1555_s3 = inlined_call_operand.vmem [shape: bf16[32,32], index: 3, kind: input, shape index: {}]   ;;  %s1556_s0 = inlined_call_operand.vmem [shape: f32[2,8,32], index: 0, kind: input, shape index: {}]   ;;  %s1557_s6 = inlined_call_operand.vmem [shape: f32[1,32], index: 6, kind: input, shape index: {}, may-alias: {4,6,8,10,12}]   ;;  %s1558_s2 = inlined_call_operand.vmem [shape: f32[64,32], index: 2, kind: input, shape index: {}]   ;;  %s1559_s4 = inlined_call_operand.vmem [shape: f32[1,32], index: 4, kind: input, shape index: {}, may-alias: {4,6,8,10,12}]   ;;  %s1560_s7 = inlined_call_operand.vmem [shape: bf16[32,32], index: 7, kind: input, shape index: {}]   ;;  %s1561_s9 = inlined_call_operand.vmem [shape: bf16[32,32], index: 9, kind: input, shape index: {}]   ;;  %s1562_s8 = inlined_call_operand.vmem [shape: f32[1,32], index: 8, kind: input, shape index: {}, may-alias: {4,6,8,10,12}]   ;;  %s1563_s11 = inlined_call_operand.vmem [shape: bf16[32,32], index: 11, kind: input, shape index: {}]   ;;  %s1564_s10 = inlined_call_operand.vmem [shape: f32[1,32], index: 10, kind: input, shape index: {}, may-alias: {4,6,8,10,12}]   ;;  %s1565_s13 = inlined_call_operand.vmem [shape: bf16[32,128], index: 13, kind: input, shape index: {}]   ;;  %s1566_s12 = inlined_call_operand.vmem [shape: f32[1,32], index: 12, kind: input, shape index: {}, may-alias: {4,6,8,10,12}]   ;;  %s1567_s14 = inlined_call_operand.vmem [shape: f32[1,128], index: 14, kind: input, shape index: {}]   ;;  %s1568_s15 = inlined_call_operand.vmem [shape: f32[2,1,128], index: 15, kind: output, shape index: {}]  }
   0x1   :  { %v1153_v0 = vld [vmem:[%s1553_s5] sm:$0xff]   ;;  %1040 = vmatprep.subr.bf16.mxu0 %v1181_v1  ;;  %1044 = vmatprep.mubr.msk.bf16.mxu0 %vm1182_vm0, %v1181_v1  ;;  %v1154_v2 = vld [vmem:[%s1553_s5 + $0x8] sm:$0xff]   ;;  %v1157_v5 = vld [vmem:[%s1554_s1 + $0x10] sm:$0xff]   ;;  %vm725_vm3 = vcmask 1041409  }
   0x2   :  { %1048 = vmatprep.subr.bf16.mxu1 %v1153_v0  ;;  %v1155_v3 = vld [vmem:[%s1554_s1] sm:$0xff]   ;;  %v1156_v4 = vld [vmem:[%s1554_s1 + $0x8] sm:$0xff]   ;;  %v1158_v12 = vld [vmem:[%s1554_s1 + $0x18] sm:$0xff]  }
   0x3   :  { %1049 = vmatpush3.bf16.msra.mxu1 %v1153_v0  ;;  %1052 = vmatprep.mubr.msk.bf16.mxu1 %vm93_vm1, %v1155_v3  ;;  %v1161_v6 = vld [vmem:[%s1555_s3] sm:$0xff]   ;;  %v1164_v7 = vld [vmem:[%s1555_s3 + $0x8] sm:$0xff]   ;;  %v1162_v15 = vld [vmem:[%s1554_s1 + $0x30] sm:$0xff]  }
   0x4   :  { %1050 = vmatprep.subr.bf16.mxu1 %v1154_v2  ;;  %1041 = vmatpush3.bf16.msra.mxu0 %v1161_v6  ;;  %v1298_v8 = vld [vmem:[%s1556_s0] sm:$0xff]  ;;  %v1303_v9 = vld [vmem:[%s1556_s0 + $0x8] sm:$0xff]  ;;  %v1163_v16 = vld [vmem:[%s1554_s1 + $0x38] sm:$0xff]  }
   0x5   :  { %1042 = vmatprep.subr.bf16.mxu0 %v1181_v1  ;;  %v972_v10 = vld [vmem:[%s1557_s6] ss:$0 sm:$0xff]  ;;  %v69_v11 = vpack.c.bf16 %v1303_v9, %v1298_v8  ;;  %v1160_v14 = vld [vmem:[%s1554_s1 + $0x28] sm:$0xff]   ;;  %v317_v19 = vld [vmem:[%s1558_s2 + $0x10] sm:$0xff] }
   0x6   :  { %345 = vrot.lane.b32.xlu1 %v972_v10, %s1183_s22  ;;  %v1159_v13 = vld [vmem:[%s1554_s1 + $0x20] sm:$0xff]   ;;  %v318_v20 = vld [vmem:[%s1558_s2 + $0x18] sm:$0xff]  ;;  %v316_v23 = vld [vmem:[%s1558_s2 + $0x8] sm:$0xff] }
   0x7   :  { %1051 = vmatpush3.bf16.msra.mxu1 %v1154_v2  ;;  %v315_v22 = vld [vmem:[%s1558_s2] sm:$0xff]  ;;  %v321_v40 = vld [vmem:[%s1558_s2 + $0x30] sm:$0xff]  ;;  %v322_v42 = vld [vmem:[%s1558_s2 + $0x38] sm:$0xff] }
   0x8   :  { %1080 = vmatprep.subr.bf16.mxu1 %v1181_v1  ;;  %1043 = vmatpush3.bf16.msra.mxu0 %v1164_v7  ;;  %v319_v45 = vld [vmem:[%s1558_s2 + $0x20] sm:$0xff]  ;;  %v320_v46 = vld [vmem:[%s1558_s2 + $0x28] sm:$0xff] }
   0x9   :  { %1068 = vmatprep.subr.bf16.mxu0 %v1181_v1 }
   0xa   :  { %1053 = vmatmul.mubr.msk.bf16.vlgmr.msra.gmra.mrb[0].mxu1 %vm93_vm1, %v1156_v4 }
   0xb   :  { %1056 = vmatprep.mubr.msk.bf16.mxu1 %vm93_vm1, %v1157_v5  ;;  %1045 = vmatmul.mubr.msk.bf16.vlgmr.msra.gmra.mrb[0].mxu0 %vm93_vm1, %v69_v11 }
   0xc   :  { %1076 = vmatprep.mubr.msk.bf16.mxu0 %vm1182_vm0, %v1181_v1 }
  0x12   :  { %1057 = vmatmul.mubr.msk.bf16.gmra.mrb[4].mxu1 %vm93_vm1, %v1158_v12 }
  0x13   :  { %1060 = vmatprep.mubr.msk.bf16.mxu1 %vm93_vm1, %v1159_v13 }
  0x1a   :  { %1061 = vmatmul.mubr.msk.bf16.gmra.mrb[8].mxu1 %vm93_vm1, %v1160_v14 }
  0x1b   :  { %1064 = vmatprep.mubr.msk.bf16.mxu1 %vm93_vm1, %v1162_v15 }
  0x22   :  { %1065 = vmatmul.mubr.msk.bf16.gmra.mrb[12].mxu1 %vm93_vm1, %v1163_v16 }
  0x23   :  { %1088 = vmatprep.mubr.msk.bf16.mxu1 %vm1182_vm0, %v1181_v1 }
  0x78   :  { %v1336_v17 = vpop.permute.xlu1 %345 }
  0xdd   :  { %v1054_v18 = vpop.f32.mrb[0].mxu1 }
  0xde   :  { %v252_v21 = vpop.f32.mrb[1].mxu1  ;;  %v325_v25 = vadd.f32 %v1054_v18, %v317_v19  ;;  %v1351_v26 = vadd.f32 %v1054_v18, %v1336_v17  ;;  %v1366_v38 = vpop.f32.mrb[0].mxu0 }
  0xdf   :  { %v1055_v24 = vpop.f32.mrb[2].mxu1  ;;  %v323_v30 = vadd.f32 %v315_v22, %v252_v21  ;;  %v1357_v31 = vadd.f32 %v1336_v17, %v252_v21  ;;  %v1046_v43 = vpop.f32.mrb[1].mxu0 }
  0xe0   :  { %v326_v27 = vadd.f32 %v1055_v24, %v318_v20  ;;  %v1354_v28 = vadd.f32 %v1055_v24, %v1336_v17  ;;  %v255_v29 = vpop.f32.mrb[3].mxu1  ;;  %v1381_v47 = vpop.f32.mrb[2].mxu0 }
  0xe1   :  { %v324_v32 = vadd.f32 %v316_v23, %v255_v29  ;;  %v1360_v33 = vadd.f32 %v1336_v17, %v255_v29  ;;  %v1047_v49 = vpop.f32.mrb[3].mxu0 }
  0xe2   :  { %v367_v34 = vpack.c.bf16 %v326_v27, %v325_v25  ;;  %v512_v35 = vpack.c.bf16 %v1354_v28, %v1351_v26 }
  0xe3   :  { %v366_v36 = vpack.c.bf16 %v324_v32, %v323_v30  ;;  %v511_v37 = vpack.c.bf16 %v1360_v33, %v1357_v31 }
  0xe4   :  { %v381_v0 = vsel %vm93_vm1, %v367_v34, 0 }
  0xe5   :  { %v1058_v39 = vpop.f32.mrb[4].mxu1  ;;  %v378_v41 = vsel %vm93_vm1, %v366_v36, 0 }
  0xe6   :  { %v268_v44 = vpop.f32.mrb[5].mxu1  ;;  %1069 = vmatpush3.bf16.xpose.msra.mxu0 %v378_v41  ;;  %v329_v50 = vadd.f32 %v1058_v39, %v321_v40  ;;  %v1385_v51 = vadd.f32 %v1058_v39, %v1336_v17 }
  0xe7   :  { %v1059_v48 = vpop.f32.mrb[6].mxu1  ;;  %1070 = vmatprep.subr.bf16.mxu0 %v1181_v1  ;;  %v327_v55 = vadd.f32 %v319_v45, %v268_v44  ;;  %v1391_v56 = vadd.f32 %v1336_v17, %v268_v44  ;;  %v950_v44 = vld [vmem:[%s1559_s4] ss:$0 sm:$0xff]  ;;  %s1184_s4 = smov 96  }
  0xe8   :  { %v330_v52 = vadd.f32 %v1059_v48, %v322_v42  ;;  %v1388_v53 = vadd.f32 %v1059_v48, %v1336_v17  ;;  %v271_v54 = vpop.f32.mrb[7].mxu1 }
  0xe9   :  { %v328_v57 = vadd.f32 %v320_v46, %v271_v54  ;;  %v1394_v58 = vadd.f32 %v1336_v17, %v271_v54 }
  0xea   :  { %v369_v59 = vpack.c.bf16 %v330_v52, %v329_v50  ;;  %v514_v60 = vpack.c.bf16 %v1388_v53, %v1385_v51  ;;  %v132_v50 = vadd.f32 %v950_v44, %v1366_v38  ;;  %v135_v38 = vadd.f32 %v950_v44, %v1381_v47  ;;  %v1168_v44 = vld [vmem:[%s1561_s9 + $0x8] sm:$0xff]  }
  0xeb   :  { %v368_v61 = vpack.c.bf16 %v328_v57, %v327_v55  ;;  %v513_v62 = vpack.c.bf16 %v1394_v58, %v1391_v56 }
  0xec   :  { %v387_v49 = vsel %vm93_vm1, %v369_v59, 0  ;;  %v365_v54 = vpack.c.bf16 %v135_v38, %v135_v38 }
  0xed   :  { %v1062_v63 = vpop.f32.mrb[8].mxu1 }
  0xee   :  { %v284_v2 = vpop.f32.mrb[9].mxu1  ;;  %1071 = vmatpush3.bf16.xpose.msra.mxu0 %v381_v0  ;;  %v333_v4 = vadd.f32 %v1062_v63, %v317_v19  ;;  %v1403_v5 = vadd.f32 %v1062_v63, %v1336_v17 }
  0xef   :  { %v1063_v3 = vpop.f32.mrb[10].mxu1  ;;  %1072 = vmatprep.subr.bf16.mxu0 %v1181_v1  ;;  %v331_v11 = vadd.f32 %v315_v22, %v284_v2  ;;  %v1409_v12 = vadd.f32 %v1336_v17, %v284_v2 }
  0xf0   :  { %v334_v6 = vadd.f32 %v1063_v3, %v318_v20  ;;  %v1406_v7 = vadd.f32 %v1063_v3, %v1336_v17  ;;  %v287_v10 = vpop.f32.mrb[11].mxu1  ;;  %v384_v20 = vsel %vm93_vm1, %v368_v61, 0 }
  0xf1   :  { %v332_v13 = vadd.f32 %v316_v23, %v287_v10  ;;  %v1412_v14 = vadd.f32 %v1336_v17, %v287_v10 }
  0xf2   :  { %v371_v15 = vpack.c.bf16 %v334_v6, %v333_v4  ;;  %v516_v16 = vpack.c.bf16 %v1406_v7, %v1403_v5 }
  0xf3   :  { %v370_v18 = vpack.c.bf16 %v332_v13, %v331_v11  ;;  %v515_v19 = vpack.c.bf16 %v1412_v14, %v1409_v12 }
  0xf5   :  { %v433_v21 = vsel %vm93_vm1, %v370_v18, 0  ;;  %v1066_v22 = vpop.f32.mrb[12].mxu1 }
  0xf6   :  { %1073 = vmatpush3.bf16.xpose.msra.mxu0 %v384_v20  ;;  %1081 = vmatpush3.bf16.xpose.msra.mxu1 %v433_v21  ;;  %v337_v24 = vadd.f32 %v1066_v22, %v321_v40  ;;  %v1421_v23 = vadd.f32 %v1066_v22, %v1336_v17  ;;  %v300_v25 = vpop.f32.mrb[13].mxu1 }
  0xf7   :  { %v335_v27 = vadd.f32 %v319_v45, %v300_v25  ;;  %v360_v29 = vadd.f32 %v1336_v17, %v300_v25  ;;  %v1067_v30 = vpop.f32.mrb[14].mxu1  ;;  %1074 = vmatprep.subr.bf16.mxu0 %v1181_v1  ;;  %1082 = vmatprep.subr.bf16.mxu1 %v1181_v1  ;;  %v1166_v25 = vld [vmem:[%s1560_s7 + $0x8] sm:$0xff]  }
  0xf8   :  { %v338_v32 = vadd.f32 %v1067_v30, %v322_v42  ;;  %v1427_v34 = vadd.f32 %v1067_v30, %v1336_v17  ;;  %v303_v36 = vpop.f32.mrb[15].mxu1  ;;  %v436_v42 = vsel %vm93_vm1, %v371_v15, 0 }
  0xf9   :  { %v336_v39 = vadd.f32 %v320_v46, %v303_v36  ;;  %v361_v40 = vadd.f32 %v1336_v17, %v303_v36  ;;  %v364_v17 = vpack.c.bf16 %v132_v50, %v132_v50 }
  0xfa   :  { %v373_v41 = vpack.c.bf16 %v338_v32, %v337_v24  ;;  %v518_v43 = vpack.c.bf16 %v1427_v34, %v1421_v23  ;;  %v1165_v23 = vld [vmem:[%s1560_s7] sm:$0xff]  }
  0xfb   :  { %v372_v45 = vpack.c.bf16 %v336_v39, %v335_v27  ;;  %v517_v48 = vpack.c.bf16 %v361_v40, %v360_v29 }
  0xfc   :  { %v442_v52 = vsel %vm93_vm1, %v373_v41, 0 }
  0xfd   :  { %v439_v46 = vsel %vm93_vm1, %v372_v45, 0  ;;  %v977_v45 = vld [vmem:[%s1562_s8] ss:$0 sm:$0xff] }
  0xfe   :  { %1075 = vmatpush3.bf16.xpose.msra.mxu0 %v387_v49  ;;  %1083 = vmatpush3.bf16.xpose.msra.mxu1 %v436_v42 }
  0xff   :  { %1084 = vmatprep.subr.bf16.mxu1 %v1181_v1  ;;  %1092 = vmatprep.subr.bf16.mxu0 %v1181_v1 }
 0x105   :  { %1077 = vmatmul.mubr.msk.bf16.vlgmr.msra.gmra.mrb[4].mxu0 %vm93_vm1, %v364_v17 }
 0x106   :  { %1085 = vmatpush3.bf16.xpose.msra.mxu1 %v439_v46  ;;  %1100 = vmatprep.mubr.msk.bf16.mxu0 %vm1182_vm0, %v1181_v1 }
 0x107   :  { %1086 = vmatprep.subr.bf16.mxu1 %v1181_v1 }
 0x10e   :  { %1087 = vmatpush3.bf16.xpose.msra.mxu1 %v442_v52 }
 0x10f   :  { %1104 = vmatprep.subr.bf16.mxu1 %v1181_v1 }
 0x115   :  { %1089 = vmatmul.mubr.msk.bf16.vlgmr.msra.gmra.mrb[16].mxu1 %vm93_vm1, %v365_v54 }
 0x116   :  { %1112 = vmatprep.mubr.msk.bf16.mxu1 %vm1182_vm0, %v1181_v1 }
 0x1d8   :  { %v423_v55 = vpop.f32.mrb[4].mxu0 }
 0x1d9   :  { %v484_v57 = vmul.f32 0.17677669, %v423_v55  ;;  %v1078_v59 = vpop.f32.mrb[5].mxu0 }
 0x1da   :  { %v426_v61 = vpop.f32.mrb[6].mxu0 }
 0x1db   :  { %v487_v63 = vsel %vm486_vm2, %v484_v57, -inf  ;;  %v1079_v0 = vpop.f32.mrb[7].mxu0 }
 0x1dc   :  { %488 = vmax.xlane.f32.xlu0 %v487_v63 }
 0x1e8   :  { %v478_v2 = vpop.f32.mrb[16].mxu1 }
 0x1e9   :  { %v485_v3 = vmul.f32 0.17677669, %v478_v2  ;;  %v1090_v47 = vpop.f32.mrb[17].mxu1  ;;  %v981_v2 = vld [vmem:[%s1564_s10] ss:$0 sm:$0xff] }
 0x1ea   :  { %v481_v4 = vpop.f32.mrb[18].mxu1 }
 0x1eb   :  { %v1091_v6 = vpop.f32.mrb[19].mxu1  ;;  %v490_v10 = vsel %vm486_vm2, %v485_v3, -inf }
 0x1ec   :  { %491 = vmax.xlane.f32.xlu0 %v490_v10 }
 0x202   :  { %523 = vrot.lane.b32.xlu0 %v511_v37, %s1184_s4 }
 0x206   :  { %582 = vrot.lane.b32.xlu0 %v515_v19, %s1184_s4 }
 0x20a   :  { %525 = vrot.lane.b32.xlu0 %v512_v35, %s1184_s4 }
 0x20e   :  { %527 = vrot.lane.b32.xlu0 %v513_v62, %s1184_s4 }
 0x212   :  { %586 = vrot.lane.b32.xlu0 %v517_v48, %s1184_s4 }
 0x216   :  { %529 = vrot.lane.b32.xlu0 %v514_v60, %s1184_s4 }
 0x269   :  { %v489_v31 = vpop.xlane.xlu0 %488 }
 0x26a   :  { %v493_v33 = vsub.f32 %v484_v57, %v489_v31 }
 0x26c   :  { %v495_v37 = vmul.f32 1.442695, %v493_v33 }
 0x26e   :  { %1173 = vpow2.f32 %v495_v37  ;;  %v1171_v37 = vld [vmem:[%s1565_s13] sm:$0xff]  }
 0x278   :  { %v1174_v11 = vpop.eup %1173 }
 0x279   :  { %v492_v12 = vpop.xlane.xlu0 %491  ;;  %v499_v26 = vsel %vm486_vm2, %v1174_v11, 0.0 }
 0x27a   :  { %v494_v28 = vsub.f32 %v485_v3, %v492_v12  ;;  %500 = vadd.xlane.f32.xlu1 %v499_v26  ;;  %v985_v12 = vld [vmem:[%s1566_s12] ss:$0 sm:$0xff] }
 0x27c   :  { %v497_v35 = vmul.f32 1.442695, %v494_v28 }
 0x27d   :  { %v524_v56 = vpop.permute.xlu0 %523 }
 0x27e   :  { %1175 = vpow2.f32 %v497_v35  ;;  %1093 = vmatpush3.bf16.msra.mxu0 %v524_v56 }
 0x27f   :  { %1094 = vmatprep.subr.bf16.mxu0 %v1181_v1 }
 0x281   :  { %v583_v58 = vpop.permute.xlu0 %582 }
 0x282   :  { %1105 = vmatpush3.bf16.msra.mxu1 %v583_v58 }
 0x283   :  { %1106 = vmatprep.subr.bf16.mxu1 %v1181_v1 }
 0x285   :  { %v526_v51 = vpop.permute.xlu0 %525 }
 0x286   :  { %1095 = vmatpush3.bf16.msra.mxu0 %v526_v51 }
 0x287   :  { %1096 = vmatprep.subr.bf16.mxu0 %v1181_v1 }
 0x288   :  { %v1176_v53 = vpop.eup %1175 }
 0x289   :  { %v528_v60 = vpop.permute.xlu0 %527  ;;  %v502_v62 = vsel %vm486_vm2, %v1176_v53, 0.0 }
 0x28a   :  { %503 = vadd.xlane.f32.xlu0 %v502_v62  ;;  %1097 = vmatpush3.bf16.msra.mxu0 %v528_v60  ;;  %v1185_v60 = vmov 1966171168   ;;  %v923_v62 = vlaneseq }
 0x28b   :  { %584 = vrot.lane.b32.xlu1 %v516_v16, %s1184_s4  ;;  %1098 = vmatprep.subr.bf16.mxu0 %v1181_v1 }
 0x28d   :  { %v587_v13 = vpop.permute.xlu0 %586 }
 0x291   :  { %v530_v14 = vpop.permute.xlu0 %529 }
 0x292   :  { %1099 = vmatpush3.bf16.msra.mxu0 %v530_v14  ;;  %v924_v14 = vshrl.u32 %v923_v62, 7 }
 0x293   :  { %1116 = vmatprep.subr.bf16.mxu0 %v1181_v1 }
 0x2a0   :  { %588 = vrot.lane.b32.xlu0 %v518_v43, %s1184_s4  ;;  %v1167_v43 = vld [vmem:[%s1561_s9] sm:$0xff]  }
 0x307   :  { %v501_v15 = vpop.xlane.xlu1 %500 }
 0x308   :  { %1177 = vrcp.f32 %v501_v15  ;;  %v989_v15 = vld [vmem:[%s1567_s14] ss:$0 sm:$0xff] }
 0x30b   :  { %v585_v18 = vpop.permute.xlu1 %584 }
 0x30c   :  { %1107 = vmatpush3.bf16.msra.mxu1 %v585_v18 }
 0x30d   :  { %1108 = vmatprep.subr.bf16.mxu1 %v1181_v1 }
 0x310   :  { %1109 = vmatpush3.bf16.msra.mxu1 %v587_v13 }
 0x311   :  { %1110 = vmatprep.subr.bf16.mxu1 %v1181_v1 }
 0x312   :  { %v1178_v5 = vpop.eup %1177 }
 0x313   :  { %v507_v7 = vmul.f32 %v1178_v5, %v1174_v11  ;;  %v1172_v11 = vld [vmem:[%s1565_s13 + $0x8] sm:$0xff]  }
 0x315   :  { %v509_v16 = vpack.c.bf16 %v507_v7, %v507_v7 }
 0x317   :  { %1101 = vmatmul.mubr.msk.bf16.vlgmr.msra.gmra.mrb[8].mxu0 %vm486_vm2, %v509_v16  ;;  %v504_v19 = vpop.xlane.xlu0 %503 }
 0x318   :  { %1179 = vrcp.f32 %v504_v19  ;;  %1120 = vmatprep.mubr.msk.bf16.mxu0 %vm1182_vm0, %v1181_v1  ;;  %1117 = vmatpush3.bf16.msra.mxu0 %v1165_v23 }
 0x319   :  { %1118 = vmatprep.subr.bf16.mxu0 %v1181_v1 }
 0x31b   :  { %v589_v20 = vpop.permute.xlu0 %588 }
 0x31c   :  { %1111 = vmatpush3.bf16.msra.mxu1 %v589_v20  ;;  %1119 = vmatpush3.bf16.msra.mxu0 %v1166_v25 }
 0x31d   :  { %1124 = vmatprep.subr.bf16.mxu1 %v1181_v1  ;;  %1132 = vmatprep.subr.bf16.mxu0 %v1181_v1 }
 0x322   :  { %v1180_v21 = vpop.eup %1179 }
 0x323   :  { %v508_v22 = vmul.f32 %v1180_v21, %v1176_v53 }
 0x325   :  { %v510_v24 = vpack.c.bf16 %v508_v22, %v508_v22 }
 0x327   :  { %1113 = vmatmul.mubr.msk.bf16.vlgmr.msra.gmra.mrb[20].mxu1 %vm486_vm2, %v510_v24 }
 0x328   :  { %1128 = vmatprep.mubr.msk.bf16.mxu1 %vm1182_vm0, %v1181_v1  ;;  %1125 = vmatpush3.bf16.msra.mxu1 %v1167_v43 }
 0x329   :  { %1126 = vmatprep.subr.bf16.mxu1 %v1181_v1 }
 0x32c   :  { %1127 = vmatpush3.bf16.msra.mxu1 %v1168_v44 }
 0x32d   :  { %1140 = vmatprep.subr.bf16.mxu1 %v1181_v1 }
 0x3ea   :  { %v572_v27 = vpop.f32.mrb[8].mxu0 }
 0x3eb   :  { %v1102_v29 = vpop.f32.mrb[9].mxu0 }
 0x3ec   :  { %v575_v30 = vpop.f32.mrb[10].mxu0 }
 0x3ed   :  { %v1103_v32 = vpop.f32.mrb[11].mxu0 }
 0x3fa   :  { %v631_v34 = vpop.f32.mrb[20].mxu1 }
 0x3fb   :  { %v637_v36 = vpack.c.bf16 %v631_v34, %v572_v27  ;;  %v1114_v39 = vpop.f32.mrb[21].mxu1 }
 0x3fc   :  { %v634_v40 = vpop.f32.mrb[22].mxu1 }
 0x3fd   :  { %v1115_v41 = vpop.f32.mrb[23].mxu1  ;;  %1121 = vmatmul.mubr.msk.bf16.vlgmr.msra.gmra.mrb[12].mxu0 %vm93_vm1, %v637_v36 }
 0x3fe   :  { %1136 = vmatprep.mubr.msk.bf16.mxu0 %vm1182_vm0, %v1181_v1 }
 0x4d0   :  { %v698_v48 = vpop.f32.mrb[12].mxu0 }
 0x4d1   :  { %v699_v49 = vadd.f32 %v977_v45, %v698_v48  ;;  %v1122_v42 = vpop.f32.mrb[13].mxu0 }
 0x4d2   :  { %v701_v50 = vpop.f32.mrb[14].mxu0 }
 0x4d3   :  { %v705_v17 = vadd.f32 %v699_v49, %v1298_v8  ;;  %v702_v46 = vadd.f32 %v977_v45, %v701_v50  ;;  %v1123_v52 = vpop.f32.mrb[15].mxu0  ;;  %v1169_v8 = vld [vmem:[%s1563_s11] sm:$0xff]  }
 0x4d4   :  { %1133 = vmatpush3.bf16.msra.mxu0 %v1169_v8 }
 0x4d5   :  { %v706_v38 = vadd.f32 %v702_v46, %v1303_v9  ;;  %v707_v54 = vpack.c.bf16 %v705_v17, %v705_v17  ;;  %1134 = vmatprep.subr.bf16.mxu0 %v1181_v1  ;;  %v1170_v9 = vld [vmem:[%s1563_s11 + $0x8] sm:$0xff]  }
 0x4d7   :  { %v708_v55 = vpack.c.bf16 %v706_v38, %v706_v38  ;;  %v722_v59 = vunpack.c.l.b16 %v707_v54 }
 0x4d8   :  { %1135 = vmatpush3.bf16.msra.mxu0 %v1170_v9 }
 0x4d9   :  { %v723_v57 = vunpack.c.l.b16 %v708_v55 }
 0x4db   :  { %v724_v61 = vrot.slane %v723_v57, 7 }
 0x4dd   :  { %v726_v63 = vsel %vm725_vm3, %v724_v61, %v722_v59 }
 0x4de   :  { %v727_v0 = vpack.c.b16 %v726_v63, %v726_v63 }
 0x4e0   :  { %1129 = vmatmul.mubr.msk.bf16.vlgmr.msra.gmra.mrb[24].mxu1 %vm93_vm1, %v727_v0 }
 0x4e1   :  { %1144 = vmatprep.mubr.msk.bf16.mxu1 %vm1182_vm0, %v1181_v1  ;;  %1141 = vmatpush3.bf16.msra.mxu1 %v1171_v37 }
 0x4e2   :  { %1142 = vmatprep.subr.bf16.mxu1 %v1181_v1  ;;  %v921_v1 = vunpack.c.l.s4 %v1185_v60 }
 0x4e4   :  { %v922_v13 = vunpack.c.0.s8 %v921_v1 }
 0x4e5   :  { %1143 = vmatpush3.bf16.msra.mxu1 %v1172_v11 }
 0x4e6   :  { %v925_v18 = vsub.s32 %v922_v13, %v924_v14 }
 0x5b3   :  { %v777_v3 = vpop.f32.mrb[24].mxu1 }
 0x5b4   :  { %v778_v47 = vadd.f32 %v981_v2, %v777_v3  ;;  %v1130_v4 = vpop.f32.mrb[25].mxu1 }
 0x5b5   :  { %v780_v6 = vpop.f32.mrb[26].mxu1 }
 0x5b6   :  { %v783_v10 = vmax.f32 %v778_v47, 0.0  ;;  %v1131_v31 = vpop.f32.mrb[27].mxu1 }
 0x5b8   :  { %v784_v33 = vpack.c.bf16 %v783_v10, %v783_v10 }
 0x5ba   :  { %1137 = vmatmul.mubr.msk.bf16.vlgmr.msra.gmra.mrb[16].mxu0 %vm93_vm1, %v784_v33 }
 0x68d   :  { %v845_v26 = vpop.f32.mrb[16].mxu0 }
 0x68e   :  { %v846_v28 = vadd.f32 %v985_v12, %v845_v26  ;;  %v1138_v35 = vpop.f32.mrb[17].mxu0 }
 0x68f   :  { %v848_v56 = vpop.f32.mrb[18].mxu0 }
 0x690   :  { %v851_v58 = vmax.f32 %v846_v28, 0.0  ;;  %v1139_v51 = vpop.f32.mrb[19].mxu0 }
 0x692   :  { %v852_v53 = vpack.c.bf16 %v851_v58, %v851_v58 }
 0x694   :  { %1145 = vmatmul.mubr.msk.bf16.vlgmr.msra.gmra.mrb[28].mxu1 %vm93_vm1, %v852_v53 }
 0x767   :  { %v913_v5 = vpop.f32.mrb[28].mxu1 }
 0x768   :  { %v914_v7 = vadd.f32 %v989_v15, %v913_v5  ;;  %v1146_v16 = vpop.f32.mrb[29].mxu1 }
 0x769   :  { %v916_v19 = vpop.f32.mrb[30].mxu1 }
 0x76a   :  { %v926_v20 = vrot.slane %v914_v7, %v925_v18  ;;  %v1147_v21 = vpop.f32.mrb[31].mxu1 }
 0x76c   :  { %v927_v22 = vcombine.high %v926_v20, %v926_v20  ;;  %993 = vst.sshfl [vmem:[%s1568_s15] sm:$0x1 pattern:$0x73625140] %v926_v20 }
 0x76e   :  { %994 = vst.sshfl [vmem:[%s1568_s15 + $0x1] sm:$0x1 pattern:$0x73625140] %v927_v22 }

</bundles_post_ra>
